<compile_context>
chip_gen: v7x
topology: tpu7x:2x2x1
jax: 0.10.0
libtpu: 0.0.40
codegen_flags: <defaults>
</compile_context>

<pallas_src>
import jax
import jax.numpy as jnp
from jax.experimental import pallas as pl
from jax.experimental.pallas import tpu as pltpu


def _softmax_rows(z):
    """Stable softmax over axis=1 (lanes).

    Returns (softmax(z), r) with r == 1/sum(exp(z - max(z))).  The max element
    of the returned softmax equals r bit-exactly (exp(0) == 1), so callers can
    reuse r for torch.max(softmax, dim=1).values with no extra XLU reduce.
    """
    m = jnp.max(z, axis=1, keepdims=True)
    e = jnp.exp(z - m)
    r = pl.reciprocal(jnp.sum(e, axis=1, keepdims=True), approx=False)
    return e * r, r


def _dla_block(h, y, w1, b1, w2, b2, factor):
    out = jnp.dot(h, w1, preferred_element_type=jnp.float32) + b1
    out, _ = _softmax_rows(out)
    out = jnp.dot(out, w2, preferred_element_type=jnp.float32) + b2
    out1, inv_sum = _softmax_rows(out)
    # torch.max(out1, dim=1).values == inv_sum  (see _softmax_rows)
    out2 = y * (inv_sum * factor)
    out, _ = _softmax_rows(out1 + out2)
    return out


def make_dla_kernel(factor):
    def dla_kernel(x_ref, y_ref, w_ref, b_ref, o_ref):
        y = y_ref[...]
        h = x_ref[...]
        for blk in range(2):  # static unroll: two stacked dla blocks
            h = _dla_block(
                h, y,
                w_ref[2 * blk], b_ref[2 * blk],
                w_ref[2 * blk + 1], b_ref[2 * blk + 1],
                factor)
        o_ref[...] = h
    return dla_kernel


def dla_forward(x, y, w_stack, b_stack, classes, *, block_b=None):
    """x, y: (B, C) f32.
    w_stack: (4, C, C) pre-transposed (in, out) weights, in order
             [blk1.linear1, blk1.linear2, blk2.linear1, blk2.linear2].
    b_stack: (4, 1, C) biases (same order)."""
    B, C = x.shape
    if block_b is None:
        block_b = B if B <= 128 else 128
    assert B % block_b == 0, "batch must divide the batch tile"
    grid = (B // block_b,)

    row_spec = pl.BlockSpec((block_b, C), lambda i: (i, 0))
    # Parameters: same block index every grid step -> stay resident in VMEM.
    w_spec = pl.BlockSpec((4, C, C), lambda i: (0, 0, 0))
    b_spec = pl.BlockSpec((4, 1, C), lambda i: (0, 0, 0))

    flops = 2 * (2 * 2 * B * C * C)        # 4 matmuls of (B,C) x (C,C)
    transcendentals = 6 * B * C            # 6 row softmaxes worth of exp
    bytes_accessed = 4 * (3 * B * C + 4 * C * C + 4 * C)

    return pl.pallas_call(
        make_dla_kernel(float(classes)),
        out_shape=jax.ShapeDtypeStruct((B, C), jnp.float32),
        grid_spec=pltpu.PrefetchScalarGridSpec(
            num_scalar_prefetch=0,
            grid=grid,
            in_specs=[row_spec, row_spec, w_spec, b_spec],
            out_specs=row_spec,
        ),
        compiler_params=pltpu.CompilerParams(
            dimension_semantics=("parallel",)),
        cost_estimate=pl.CostEstimate(
            flops=flops,
            transcendentals=transcendentals,
            bytes_accessed=bytes_accessed),
    )(x, y, w_stack, b_stack)


def init_params(key, classes):
    """Mirrors _init_weights: weight ~ N(0, 1), bias = 0.  PyTorch weight is
    (out, in); we store its transpose (in, out) so the kernel does h @ W."""
    ks = jax.random.split(key, 4)
    w_stack = jnp.stack(
        [jax.random.normal(k, (classes, classes), dtype=jnp.float32)
         for k in ks])                                     # (4, C, C)
    b_stack = jnp.zeros((4, 1, classes), dtype=jnp.float32)  # (4, 1, C)
    return w_stack, b_stack


def dla_reference(x, y, w_stack, b_stack, classes):
    """Pure-JAX reference matching the PyTorch module semantics."""
    def block(h, y, w1, b1, w2, b2):
        out = jax.nn.softmax(h @ w1 + b1, axis=1)
        out1 = jax.nn.softmax(out @ w2 + b2, axis=1)
        out2 = jnp.max(out1, axis=1, keepdims=True) * float(classes)
        return jax.nn.softmax(out1 + y * out2, axis=1)
    h = block(x, y, w_stack[0], b_stack[0], w_stack[1], b_stack[1])
    h = block(h, y, w_stack[2], b_stack[2], w_stack[3], b_stack[3])
    return h


if __name__ == "__main__":
    classes = 16
    key = jax.random.PRNGKey(0)
    kx, ky, kp, kx2, ky2 = jax.random.split(key, 5)
    w_stack, b_stack = init_params(kp, classes)

    # Small shape consistent with the module interface: (B, classes).
    B = 8
    x = jax.random.normal(kx, (B, classes), dtype=jnp.float32)
    y = jax.random.normal(ky, (B, classes), dtype=jnp.float32)
    out = jax.block_until_ready(dla_forward(x, y, w_stack, b_stack, classes))
    ref = dla_reference(x, y, w_stack, b_stack, classes)
    assert out.shape == (B, classes)
    assert jnp.allclose(out, ref, atol=1e-5, rtol=1e-5), "mismatch (B=8)"

    # Batched / gridded path: batch tiled at 128 rows, parallel grid axis,
    # parameters VMEM-resident across steps.
    B2 = 256
    x2 = jax.random.normal(kx2, (B2, classes), dtype=jnp.float32)
    y2 = jax.random.normal(ky2, (B2, classes), dtype=jnp.float32)
    out2 = jax.block_until_ready(
        dla_forward(x2, y2, w_stack, b_stack, classes, block_b=128))
    ref2 = dla_reference(x2, y2, w_stack, b_stack, classes)
    assert out2.shape == (B2, classes)
    assert jnp.allclose(out2, ref2, atol=1e-5, rtol=1e-5), "mismatch (B=256)"

    print("KERNEL_OK")
</pallas_src>

<mosaic_0001>
module attributes {stable_mosaic.version = 11 : i64} {
  func.func @dla_kernel(%arg0: i32, %arg1: memref<8x16xf32, #tpu.memory_space<vmem>>, %arg2: memref<8x16xf32, #tpu.memory_space<vmem>>, %arg3: memref<4x16x16xf32, #tpu.memory_space<vmem>>, %arg4: memref<4x1x16xf32, #tpu.memory_space<vmem>>, %arg5: memref<8x16xf32, #tpu.memory_space<vmem>>) attributes {dimension_semantics = [#tpu.dimension_semantics<parallel>], iteration_bounds = array<i64: 1>, scalar_prefetch = 0 : i64, scratch_operands = 0 : i64, tpu.core_type = #tpu.core_type<tc>, window_params = [{transform_indices = @transform_0, window_bounds = array<i64: 8, 16>}, {transform_indices = @transform_1, window_bounds = array<i64: 8, 16>}, {pipeline_mode = #tpu.pipeline_mode<synchronous>, transform_indices = @transform_2, window_bounds = array<i64: 4, 16, 16>}, {pipeline_mode = #tpu.pipeline_mode<synchronous>, transform_indices = @transform_3, window_bounds = array<i64: 4, 1, 16>}, {transform_indices = @transform_4, window_bounds = array<i64: 8, 16>}]} {
    %c0 = arith.constant 0 : index
    %c0_0 = arith.constant 0 : index
    %0 = vector.load %arg2[%c0, %c0_0] : memref<8x16xf32, #tpu.memory_space<vmem>>, vector<8x16xf32>
    %c0_1 = arith.constant 0 : index
    %c0_2 = arith.constant 0 : index
    %1 = vector.load %arg1[%c0_1, %c0_2] : memref<8x16xf32, #tpu.memory_space<vmem>>, vector<8x16xf32>
    %c0_3 = arith.constant 0 : index
    %c0_4 = arith.constant 0 : index
    %c0_5 = arith.constant 0 : index
    %2 = vector.load %arg3[%c0_3, %c0_4, %c0_5] : memref<4x16x16xf32, #tpu.memory_space<vmem>>, vector<1x16x16xf32>
    %3 = vector.shape_cast %2 : vector<1x16x16xf32> to vector<16x16xf32>
    %c0_6 = arith.constant 0 : index
    %c0_7 = arith.constant 0 : index
    %c0_8 = arith.constant 0 : index
    %4 = vector.load %arg4[%c0_6, %c0_7, %c0_8] : memref<4x1x16xf32, #tpu.memory_space<vmem>>, vector<1x1x16xf32>
    %5 = vector.shape_cast %4 : vector<1x1x16xf32> to vector<1x16xf32>
    %c1 = arith.constant 1 : index
    %c0_9 = arith.constant 0 : index
    %c0_10 = arith.constant 0 : index
    %6 = vector.load %arg3[%c1, %c0_9, %c0_10] : memref<4x16x16xf32, #tpu.memory_space<vmem>>, vector<1x16x16xf32>
    %7 = vector.shape_cast %6 : vector<1x16x16xf32> to vector<16x16xf32>
    %c1_11 = arith.constant 1 : index
    %c0_12 = arith.constant 0 : index
    %c0_13 = arith.constant 0 : index
    %8 = vector.load %arg4[%c1_11, %c0_12, %c0_13] : memref<4x1x16xf32, #tpu.memory_space<vmem>>, vector<1x1x16xf32>
    %9 = vector.shape_cast %8 : vector<1x1x16xf32> to vector<1x16xf32>
    %cst = arith.constant dense<0.000000e+00> : vector<8x16xf32>
    %10 = tpu.matmul %1, %3, %cst {dimension_numbers = #tpu.dot_dimension_numbers<[1], [0], [0], [1], [0, 0, 1, 1], [], []>} : vector<8x16xf32>, vector<16x16xf32>, vector<8x16xf32> -> vector<8x16xf32>
    %11 = vector.broadcast %5 : vector<1x16xf32> to vector<8x16xf32>
    %12 = arith.addf %10, %11 : vector<8x16xf32>
    %cst_14 = arith.constant dense<0xFF800000> : vector<8xf32>
    %13 = vector.multi_reduction <maximumf>, %12, %cst_14 [1] : vector<8x16xf32> to vector<8xf32>
    %14 = vector.shape_cast %13 : vector<8xf32> to vector<8x1xf32>
    %15 = vector.broadcast %14 : vector<8x1xf32> to vector<8x16xf32>
    %16 = arith.subf %12, %15 : vector<8x16xf32>
    %17 = math.exp %16 : vector<8x16xf32>
    %cst_15 = arith.constant dense<0.000000e+00> : vector<8xf32>
    %18 = vector.multi_reduction <add>, %17, %cst_15 [1] : vector<8x16xf32> to vector<8xf32>
    %19 = vector.shape_cast %18 : vector<8xf32> to vector<8x1xf32>
    %20 = tpu.reciprocal %19 : vector<8x1xf32> -> vector<8x1xf32>
    %21 = vector.broadcast %20 : vector<8x1xf32> to vector<8x16xf32>
    %22 = arith.mulf %17, %21 : vector<8x16xf32>
    %cst_16 = arith.constant dense<0.000000e+00> : vector<8x16xf32>
    %23 = tpu.matmul %22, %7, %cst_16 {dimension_numbers = #tpu.dot_dimension_numbers<[1], [0], [0], [1], [0, 0, 1, 1], [], []>} : vector<8x16xf32>, vector<16x16xf32>, vector<8x16xf32> -> vector<8x16xf32>
    %24 = vector.broadcast %9 : vector<1x16xf32> to vector<8x16xf32>
    %25 = arith.addf %23, %24 : vector<8x16xf32>
    %cst_17 = arith.constant dense<0xFF800000> : vector<8xf32>
    %26 = vector.multi_reduction <maximumf>, %25, %cst_17 [1] : vector<8x16xf32> to vector<8xf32>
    %27 = vector.shape_cast %26 : vector<8xf32> to vector<8x1xf32>
    %28 = vector.broadcast %27 : vector<8x1xf32> to vector<8x16xf32>
    %29 = arith.subf %25, %28 : vector<8x16xf32>
    %30 = math.exp %29 : vector<8x16xf32>
    %cst_18 = arith.constant dense<0.000000e+00> : vector<8xf32>
    %31 = vector.multi_reduction <add>, %30, %cst_18 [1] : vector<8x16xf32> to vector<8xf32>
    %32 = vector.shape_cast %31 : vector<8xf32> to vector<8x1xf32>
    %33 = tpu.reciprocal %32 : vector<8x1xf32> -> vector<8x1xf32>
    %34 = vector.broadcast %33 : vector<8x1xf32> to vector<8x16xf32>
    %35 = arith.mulf %30, %34 : vector<8x16xf32>
    %cst_19 = arith.constant 1.600000e+01 : f32
    %36 = vector.broadcast %cst_19 : f32 to vector<8x1xf32>
    %37 = arith.mulf %33, %36 : vector<8x1xf32>
    %38 = vector.broadcast %37 : vector<8x1xf32> to vector<8x16xf32>
    %39 = arith.mulf %0, %38 : vector<8x16xf32>
    %40 = arith.addf %35, %39 : vector<8x16xf32>
    %cst_20 = arith.constant dense<0xFF800000> : vector<8xf32>
    %41 = vector.multi_reduction <maximumf>, %40, %cst_20 [1] : vector<8x16xf32> to vector<8xf32>
    %42 = vector.shape_cast %41 : vector<8xf32> to vector<8x1xf32>
    %43 = vector.broadcast %42 : vector<8x1xf32> to vector<8x16xf32>
    %44 = arith.subf %40, %43 : vector<8x16xf32>
    %45 = math.exp %44 : vector<8x16xf32>
    %cst_21 = arith.constant dense<0.000000e+00> : vector<8xf32>
    %46 = vector.multi_reduction <add>, %45, %cst_21 [1] : vector<8x16xf32> to vector<8xf32>
    %47 = vector.shape_cast %46 : vector<8xf32> to vector<8x1xf32>
    %48 = tpu.reciprocal %47 : vector<8x1xf32> -> vector<8x1xf32>
    %49 = vector.broadcast %48 : vector<8x1xf32> to vector<8x16xf32>
    %50 = arith.mulf %45, %49 : vector<8x16xf32>
    %c2 = arith.constant 2 : index
    %c0_22 = arith.constant 0 : index
    %c0_23 = arith.constant 0 : index
    %51 = vector.load %arg3[%c2, %c0_22, %c0_23] : memref<4x16x16xf32, #tpu.memory_space<vmem>>, vector<1x16x16xf32>
    %52 = vector.shape_cast %51 : vector<1x16x16xf32> to vector<16x16xf32>
    %c2_24 = arith.constant 2 : index
    %c0_25 = arith.constant 0 : index
    %c0_26 = arith.constant 0 : index
    %53 = vector.load %arg4[%c2_24, %c0_25, %c0_26] : memref<4x1x16xf32, #tpu.memory_space<vmem>>, vector<1x1x16xf32>
    %54 = vector.shape_cast %53 : vector<1x1x16xf32> to vector<1x16xf32>
    %c3 = arith.constant 3 : index
    %c0_27 = arith.constant 0 : index
    %c0_28 = arith.constant 0 : index
    %55 = vector.load %arg3[%c3, %c0_27, %c0_28] : memref<4x16x16xf32, #tpu.memory_space<vmem>>, vector<1x16x16xf32>
    %56 = vector.shape_cast %55 : vector<1x16x16xf32> to vector<16x16xf32>
    %c3_29 = arith.constant 3 : index
    %c0_30 = arith.constant 0 : index
    %c0_31 = arith.constant 0 : index
    %57 = vector.load %arg4[%c3_29, %c0_30, %c0_31] : memref<4x1x16xf32, #tpu.memory_space<vmem>>, vector<1x1x16xf32>
    %58 = vector.shape_cast %57 : vector<1x1x16xf32> to vector<1x16xf32>
    %cst_32 = arith.constant dense<0.000000e+00> : vector<8x16xf32>
    %59 = tpu.matmul %50, %52, %cst_32 {dimension_numbers = #tpu.dot_dimension_numbers<[1], [0], [0], [1], [0, 0, 1, 1], [], []>} : vector<8x16xf32>, vector<16x16xf32>, vector<8x16xf32> -> vector<8x16xf32>
    %60 = vector.broadcast %54 : vector<1x16xf32> to vector<8x16xf32>
    %61 = arith.addf %59, %60 : vector<8x16xf32>
    %cst_33 = arith.constant dense<0xFF800000> : vector<8xf32>
    %62 = vector.multi_reduction <maximumf>, %61, %cst_33 [1] : vector<8x16xf32> to vector<8xf32>
    %63 = vector.shape_cast %62 : vector<8xf32> to vector<8x1xf32>
    %64 = vector.broadcast %63 : vector<8x1xf32> to vector<8x16xf32>
    %65 = arith.subf %61, %64 : vector<8x16xf32>
    %66 = math.exp %65 : vector<8x16xf32>
    %cst_34 = arith.constant dense<0.000000e+00> : vector<8xf32>
    %67 = vector.multi_reduction <add>, %66, %cst_34 [1] : vector<8x16xf32> to vector<8xf32>
    %68 = vector.shape_cast %67 : vector<8xf32> to vector<8x1xf32>
    %69 = tpu.reciprocal %68 : vector<8x1xf32> -> vector<8x1xf32>
    %70 = vector.broadcast %69 : vector<8x1xf32> to vector<8x16xf32>
    %71 = arith.mulf %66, %70 : vector<8x16xf32>
    %cst_35 = arith.constant dense<0.000000e+00> : vector<8x16xf32>
    %72 = tpu.matmul %71, %56, %cst_35 {dimension_numbers = #tpu.dot_dimension_numbers<[1], [0], [0], [1], [0, 0, 1, 1], [], []>} : vector<8x16xf32>, vector<16x16xf32>, vector<8x16xf32> -> vector<8x16xf32>
    %73 = vector.broadcast %58 : vector<1x16xf32> to vector<8x16xf32>
    %74 = arith.addf %72, %73 : vector<8x16xf32>
    %cst_36 = arith.constant dense<0xFF800000> : vector<8xf32>
    %75 = vector.multi_reduction <maximumf>, %74, %cst_36 [1] : vector<8x16xf32> to vector<8xf32>
    %76 = vector.shape_cast %75 : vector<8xf32> to vector<8x1xf32>
    %77 = vector.broadcast %76 : vector<8x1xf32> to vector<8x16xf32>
    %78 = arith.subf %74, %77 : vector<8x16xf32>
    %79 = math.exp %78 : vector<8x16xf32>
    %cst_37 = arith.constant dense<0.000000e+00> : vector<8xf32>
    %80 = vector.multi_reduction <add>, %79, %cst_37 [1] : vector<8x16xf32> to vector<8xf32>
    %81 = vector.shape_cast %80 : vector<8xf32> to vector<8x1xf32>
    %82 = tpu.reciprocal %81 : vector<8x1xf32> -> vector<8x1xf32>
    %83 = vector.broadcast %82 : vector<8x1xf32> to vector<8x16xf32>
    %84 = arith.mulf %79, %83 : vector<8x16xf32>
    %cst_38 = arith.constant 1.600000e+01 : f32
    %85 = vector.broadcast %cst_38 : f32 to vector<8x1xf32>
    %86 = arith.mulf %82, %85 : vector<8x1xf32>
    %87 = vector.broadcast %86 : vector<8x1xf32> to vector<8x16xf32>
    %88 = arith.mulf %0, %87 : vector<8x16xf32>
    %89 = arith.addf %84, %88 : vector<8x16xf32>
    %cst_39 = arith.constant dense<0xFF800000> : vector<8xf32>
    %90 = vector.multi_reduction <maximumf>, %89, %cst_39 [1] : vector<8x16xf32> to vector<8xf32>
    %91 = vector.shape_cast %90 : vector<8xf32> to vector<8x1xf32>
    %92 = vector.broadcast %91 : vector<8x1xf32> to vector<8x16xf32>
    %93 = arith.subf %89, %92 : vector<8x16xf32>
    %94 = math.exp %93 : vector<8x16xf32>
    %cst_40 = arith.constant dense<0.000000e+00> : vector<8xf32>
    %95 = vector.multi_reduction <add>, %94, %cst_40 [1] : vector<8x16xf32> to vector<8xf32>
    %96 = vector.shape_cast %95 : vector<8xf32> to vector<8x1xf32>
    %97 = tpu.reciprocal %96 : vector<8x1xf32> -> vector<8x1xf32>
    %98 = vector.broadcast %97 : vector<8x1xf32> to vector<8x16xf32>
    %99 = arith.mulf %94, %98 : vector<8x16xf32>
    %c0_41 = arith.constant 0 : index
    %c0_42 = arith.constant 0 : index
    %100 = vector.load %arg5[%c0_41, %c0_42] : memref<8x16xf32, #tpu.memory_space<vmem>>, vector<8x16xf32>
    tpu.vector_store %arg5[%c0_41, %c0_42], %99 {strides = array<i32>} : memref<8x16xf32, #tpu.memory_space<vmem>>, vector<8x16xf32>,
    return
  }
  func.func @transform_0(%arg0: i32) -> (i32, i32) {
    %c0_i32 = arith.constant 0 : i32
    %c0_i32_0 = arith.constant 0 : i32
    return %arg0, %c0_i32 : i32, i32
  }
  func.func @transform_1(%arg0: i32) -> (i32, i32) {
    %c0_i32 = arith.constant 0 : i32
    %c0_i32_0 = arith.constant 0 : i32
    return %arg0, %c0_i32 : i32, i32
  }
  func.func @transform_2(%arg0: i32) -> (i32, i32, i32) {
    %c0_i32 = arith.constant 0 : i32
    %c0_i32_0 = arith.constant 0 : i32
    %c0_i32_1 = arith.constant 0 : i32
    %c0_i32_2 = arith.constant 0 : i32
    return %c0_i32, %c0_i32_0, %c0_i32_1 : i32, i32, i32
  }
  func.func @transform_3(%arg0: i32) -> (i32, i32, i32) {
    %c0_i32 = arith.constant 0 : i32
    %c0_i32_0 = arith.constant 0 : i32
    %c0_i32_1 = arith.constant 0 : i32
    %c0_i32_2 = arith.constant 0 : i32
    return %c0_i32, %c0_i32_0, %c0_i32_1 : i32, i32, i32
  }
  func.func @transform_4(%arg0: i32) -> (i32, i32) {
    %c0_i32 = arith.constant 0 : i32
    %c0_i32_0 = arith.constant 0 : i32
    return %arg0, %c0_i32 : i32, i32
  }
}

</mosaic_0001>

<bundles_post_ra>
// kernel: tpu_custom_call.1
= control target key start
LH: loop header
LB: loop body
LE: loop exit
PB: predicated region body
PF: predicated region fallthrough
CT: control target
= control target key end

     0   :  { %9 = vsyncpa [#allocation3], 0  ;;  %s790_s0 = inlined_call_operand.hbm [shape: f32[8,16], index: 0, kind: input, shape index: {}]   ;;  %s791_s1 = inlined_call_operand.hbm [shape: f32[8,16], index: 1, kind: input, shape index: {}]   ;;  %s792_s2 = inlined_call_operand.hbm [shape: f32[4,16,16], index: 2, kind: input, shape index: {}]   ;;  %s793_s3 = inlined_call_operand.vmem [shape: f32[4,1,16], index: 3, kind: input, shape index: {}]   ;;  %s794_s4 = inlined_call_operand.hbm [shape: f32[8,16], index: 4, kind: output, shape index: {}]  }
   0x1   :  { %10 = vsyncpa [#allocation6], 0 }
   0x2   :  { %11 = vsyncpa [#allocation4], 0  ;;  %s671_s15 = smov [#allocation5]   ;;  %s672_s17 = smov [#allocation2]  }
   0x3   :  { %s28_s16 = sshll.u32 %s671_s15, 4  ;;  %s18_s18 = sshll.u32 %s672_s17, 4  ;;  %s29_s16 = int_to_ptr.vmem [resolvable:$true] %s28_s16  ;;  %s19_s18 = int_to_ptr.vmem [resolvable:$true] %s18_s18 }
   0x4   :  { %s577_s21 = scalar_lea.hbm %s791_s1, 128 }
   0x5   :  { %p578_p0 = scmp.ne.s32.totalorder %s791_s1, %s577_s21  ;;  %p581_p1 = scmp.lt.u32.totalorder %s577_s21, %s791_s1 }
   0x7   :  { %p583_p2 = pnand %p581_p1, %p578_p0 }
   0x9   :  { %586 = shalt.err (!%p583_p2)
}
   0xa   :  { %s587_s26 = scalar_lea.vmem %s29_s16, 128  ;;  %p592_p4 = scmp.lt.s32.totalorder %s29_s16, %s29_s16 }
   0xb   :  { %p588_p3 = scmp.ne.s32.totalorder %s29_s16, %s587_s26  ;;  %p593_p5 = scmp.lt.s32.totalorder %s587_s26, %s587_s26 }
   0xd   :  { %p594_p6 = por %p593_p5, %p592_p4 }
   0xf   :  { %p595_p7 = pnand %p594_p6, %p588_p3 }
  0x11   :  { %598 = shalt.err (!%p595_p7)
}
  0x12   :  { %31 = dma.hbm_to_vmem [thread:$0]  %s791_s1, 128, %s29_s16, [#allocation6]  }
  0x13   :  { %s599_s5 = scalar_lea.hbm %s790_s0, 128 }
  0x14   :  { %p600_p8 = scmp.ne.s32.totalorder %s790_s0, %s599_s5  ;;  %p603_p9 = scmp.lt.u32.totalorder %s599_s5, %s790_s0 }
  0x16   :  { %p605_p10 = pnand %p603_p9, %p600_p8 }
  0x18   :  { %608 = shalt.err (!%p605_p10)
}
  0x19   :  { %s609_s10 = scalar_lea.vmem %s19_s18, 128  ;;  %p614_p12 = scmp.lt.s32.totalorder %s19_s18, %s19_s18 }
  0x1a   :  { %p610_p11 = scmp.ne.s32.totalorder %s19_s18, %s609_s10  ;;  %p615_p13 = scmp.lt.s32.totalorder %s609_s10, %s609_s10 }
  0x1c   :  { %p616_p0 = por %p615_p13, %p614_p12 }
  0x1e   :  { %p617_p1 = pnand %p616_p0, %p610_p11 }
  0x20   :  { %620 = shalt.err (!%p617_p1)
}
  0x21   :  { %21 = dma.hbm_to_vmem [thread:$0]  %s790_s0, 128, %s19_s18, [#allocation3]  }
  0x22   :  { %s673_s12 = smov [#allocation7]   ;;  %s621_s16 = scalar_lea.hbm %s792_s2, 1024 }
  0x23   :  { %s37_s13 = sshll.u32 %s673_s12, 4  ;;  %p622_p2 = scmp.ne.s32.totalorder %s792_s2, %s621_s16  ;;  %s38_s13 = int_to_ptr.vmem [resolvable:$true] %s37_s13 }
  0x24   :  { %p625_p3 = scmp.lt.u32.totalorder %s621_s16, %s792_s2 }
  0x26   :  { %p627_p4 = pnand %p625_p3, %p622_p2 }
  0x28   :  { %630 = shalt.err (!%p627_p4)
}
  0x29   :  { %s631_s22 = scalar_lea.vmem %s38_s13, 1024  ;;  %p636_p6 = scmp.lt.s32.totalorder %s38_s13, %s38_s13 }
  0x2a   :  { %p632_p5 = scmp.ne.s32.totalorder %s38_s13, %s631_s22  ;;  %p637_p7 = scmp.lt.s32.totalorder %s631_s22, %s631_s22 }
  0x2c   :  { %p638_p8 = por %p637_p7, %p636_p6 }
  0x2e   :  { %p639_p9 = pnand %p638_p8, %p632_p5 }
  0x30   :  { %642 = shalt.err (!%p639_p9)
}
  0x31   :  { %s674_s0 = smov 128   ;;  %s675_s18 = smov 8  }
  0x32   :  { %43 = dma.hbm_to_vmem [thread:$0]  %s792_s2, 1024, %s38_s13, [#allocation6], %s674_s0, %s674_s0, %s675_s18  }
  0x33   :  { %665 = dma.done.wait [#allocation3], 128  }
  0x34   :  { %666 = vsyncadd [#allocation3], 4294967168 }
  0x35   :  { %667 = dma.done.wait [#allocation6], 1152  }
  0x36   :  { %668 = vsyncadd [#allocation6], 4294966144  ;;  %v676_v0 = vmov 0.0|0.0   ;;  %vm677_vm0 = vmmov 0   ;;  %v678_v1 = vmov 0.0   ;;  %v57_v2 = vld [vmem:[#allocation7] sm:$0xff] }
  0x37   :  { %532 = vmatprep.subr.bf16.mxu0 %v676_v0  ;;  %508 = vmatprep.mubr.msk.f32.mxu0 %vm677_vm0, %v678_v1  ;;  %v58_v3 = vld [vmem:[#allocation7 + $0x8] sm:$0xff]  ;;  %v56_v5 = vld [vmem:[#allocation2] sm:$0xff]  ;;  %vm71_vm1 = vcmask 130048   ;;  %v62_v17 = vld [vmem:[#allocation7 + $0x18] sm:$0xff] }
  0x38   :  { %535 = vmatprep.subr.bf16.mxu1 %v676_v0  ;;  %515 = vmatprep.mubr.msk.f32.mxu1 %vm677_vm0, %v678_v1  ;;  %v533_v4 = vpack.c.bf16 %v58_v3, %v57_v2  ;;  %v482_v6 = vld [vmem:[%s793_s3] ss:$0 sm:$0xff]  ;;  %v484_v22 = vld [vmem:[%s793_s3 + $0x1] ss:$0 sm:$0xff]  ;;  %v757_v34 = vld [vmem:[#allocation5] sm:$0xff] }
  0x39   :  { %v61_v16 = vld [vmem:[#allocation7 + $0x10] sm:$0xff]  ;;  %v261_v45 = vld [vmem:[#allocation7 + $0x20] sm:$0xff]  ;;  %v262_v46 = vld [vmem:[#allocation7 + $0x28] sm:$0xff] }
  0x3a   :  { %534 = vmatpush3.bf16.msra.mxu0 %v533_v4  ;;  %v536_v18 = vpack.c.bf16 %v62_v17, %v61_v16  ;;  %v539_v47 = vpack.c.bf16 %v262_v46, %v261_v45  ;;  %v488_v51 = vld [vmem:[%s793_s3 + $0x2] ss:$0 sm:$0xff]  ;;  %v267_v62 = vld [vmem:[#allocation7 + $0x38] sm:$0xff]  ;;  %v490_v3 = vld [vmem:[%s793_s3 + $0x3] ss:$0 sm:$0xff]  ;;  %s679_s3 = smov [#allocation8]  }
  0x3b   :  { %538 = vmatprep.subr.bf16.mxu0 %v676_v0  ;;  %v266_v61 = vld [vmem:[#allocation7 + $0x30] sm:$0xff]  ;;  %s471_s6 = sshll.u32 %s679_s3, 4  ;;  %s472_s6 = int_to_ptr.vmem [resolvable:$true] %s471_s6 }
  0x3c   :  { %537 = vmatpush3.bf16.msra.mxu1 %v536_v18  ;;  %v542_v63 = vpack.c.bf16 %v267_v62, %v266_v61  ;;  %s643_s7 = scalar_lea.vmem %s472_s6, 128  ;;  %p648_p11 = scmp.lt.s32.totalorder %s472_s6, %s472_s6 }
  0x3d   :  { %509 = vmatmul.mubr.msk.f32.vlgmr.msra.gmra.mrb[0].mxu0 %vm71_vm1, %v56_v5  ;;  %541 = vmatprep.subr.bf16.mxu1 %v676_v0  ;;  %p644_p10 = scmp.ne.s32.totalorder %s472_s6, %s643_s7  ;;  %p649_p12 = scmp.lt.s32.totalorder %s643_s7, %s643_s7 }
  0x3e   :  { %522 = vmatprep.mubr.msk.f32.mxu0 %vm677_vm0, %v678_v1  ;;  %540 = vmatpush3.bf16.msra.mxu0 %v539_v47 }
  0x3f   :  { %p650_p13 = por %p649_p12, %p648_p11 }
  0x41   :  { %p651_p0 = pnand %p650_p13, %p644_p10 }
 0x110   :  { %v141_v7 = vpop.f32.mrb[0].mxu0 }
 0x111   :  { %v142_v8 = vadd.f32 %v482_v6, %v141_v7  ;;  %v510_v9 = vpop.f32.mrb[1].mxu0 }
 0x113   :  { %v145_v10 = vsel %vm71_vm1, %v142_v8, -inf }
 0x114   :  { %146 = vmax.xlane.f32.xlu0 %v145_v10 }
 0x1a1   :  { %v147_v11 = vpop.xlane.xlu0 %146 }
 0x1a2   :  { %v148_v12 = vsub.f32 %v142_v8, %v147_v11 }
 0x1a4   :  { %v149_v13 = vmul.f32 1.442695, %v148_v12 }
 0x1a6   :  { %553 = vpow2.f32 %v149_v13 }
 0x1b0   :  { %v554_v14 = vpop.eup %553 }
 0x1b1   :  { %v151_v15 = vsel %vm71_vm1, %v554_v14, 0.0 }
 0x1b2   :  { %152 = vadd.xlane.f32.xlu0 %v151_v15 }
 0x23f   :  { %v153_v19 = vpop.xlane.xlu0 %152 }
 0x240   :  { %555 = vrcp.f32 %v153_v19 }
 0x24a   :  { %v556_v20 = vpop.eup %555 }
 0x24b   :  { %v155_v21 = vmul.f32 %v556_v20, %v554_v14 }
 0x24d   :  { %516 = vmatmul.mubr.msk.f32.vlgmr.msra.gmra.mrb[0].mxu1 %vm71_vm1, %v155_v21 }
 0x24e   :  { %529 = vmatprep.mubr.msk.f32.mxu1 %vm677_vm0, %v678_v1  ;;  %543 = vmatpush3.bf16.msra.mxu1 %v542_v63 }
 0x320   :  { %v231_v23 = vpop.f32.mrb[0].mxu1 }
 0x321   :  { %v232_v24 = vadd.f32 %v484_v22, %v231_v23  ;;  %v517_v25 = vpop.f32.mrb[1].mxu1 }
 0x323   :  { %v235_v26 = vsel %vm71_vm1, %v232_v24, -inf }
 0x324   :  { %236 = vmax.xlane.f32.xlu1 %v235_v26 }
 0x3b1   :  { %v237_v27 = vpop.xlane.xlu1 %236 }
 0x3b2   :  { %v238_v28 = vsub.f32 %v232_v24, %v237_v27 }
 0x3b4   :  { %v239_v29 = vmul.f32 1.442695, %v238_v28 }
 0x3b6   :  { %557 = vpow2.f32 %v239_v29 }
 0x3c0   :  { %v558_v30 = vpop.eup %557 }
 0x3c1   :  { %v241_v31 = vsel %vm71_vm1, %v558_v30, 0.0 }
 0x3c2   :  { %242 = vadd.xlane.f32.xlu1 %v241_v31 }
 0x44f   :  { %v243_v32 = vpop.xlane.xlu1 %242 }
 0x450   :  { %559 = vrcp.f32 %v243_v32 }
 0x45a   :  { %v560_v33 = vpop.eup %559 }
 0x45b   :  { %v246_v35 = vmul.f32 16.0, %v560_v33  ;;  %v245_v36 = vmul.f32 %v560_v33, %v558_v30 }
 0x45d   :  { %v247_v37 = vmul.f32 %v246_v35, %v757_v34 }
 0x45f   :  { %v248_v38 = vadd.f32 %v247_v37, %v245_v36 }
 0x461   :  { %v249_v39 = vsel %vm71_vm1, %v248_v38, -inf }
 0x462   :  { %250 = vmax.xlane.f32.xlu0 %v249_v39 }
 0x4ef   :  { %v251_v40 = vpop.xlane.xlu0 %250 }
 0x4f0   :  { %v252_v41 = vsub.f32 %v248_v38, %v251_v40 }
 0x4f2   :  { %v253_v42 = vmul.f32 1.442695, %v252_v41 }
 0x4f4   :  { %561 = vpow2.f32 %v253_v42 }
 0x4fe   :  { %v562_v43 = vpop.eup %561 }
 0x4ff   :  { %v255_v44 = vsel %vm71_vm1, %v562_v43, 0.0 }
 0x500   :  { %256 = vadd.xlane.f32.xlu1 %v255_v44 }
 0x58d   :  { %v257_v48 = vpop.xlane.xlu1 %256 }
 0x58e   :  { %563 = vrcp.f32 %v257_v48 }
 0x598   :  { %v564_v49 = vpop.eup %563 }
 0x599   :  { %v259_v50 = vmul.f32 %v564_v49, %v562_v43 }
 0x59b   :  { %523 = vmatmul.mubr.msk.f32.vlgmr.msra.gmra.mrb[2].mxu0 %vm71_vm1, %v259_v50 }
 0x66e   :  { %v345_v52 = vpop.f32.mrb[2].mxu0 }
 0x66f   :  { %v346_v53 = vadd.f32 %v488_v51, %v345_v52  ;;  %v524_v54 = vpop.f32.mrb[3].mxu0 }
 0x671   :  { %v349_v55 = vsel %vm71_vm1, %v346_v53, -inf }
 0x672   :  { %350 = vmax.xlane.f32.xlu0 %v349_v55 }
 0x6ff   :  { %v351_v56 = vpop.xlane.xlu0 %350 }
 0x700   :  { %v352_v57 = vsub.f32 %v346_v53, %v351_v56 }
 0x702   :  { %v353_v58 = vmul.f32 1.442695, %v352_v57 }
 0x704   :  { %565 = vpow2.f32 %v353_v58 }
 0x70e   :  { %v566_v59 = vpop.eup %565 }
 0x70f   :  { %v355_v60 = vsel %vm71_vm1, %v566_v59, 0.0 }
 0x710   :  { %356 = vadd.xlane.f32.xlu1 %v355_v60 }
 0x79d   :  { %v357_v0 = vpop.xlane.xlu1 %356 }
 0x79e   :  { %567 = vrcp.f32 %v357_v0 }
 0x7a8   :  { %v568_v1 = vpop.eup %567 }
 0x7a9   :  { %v359_v2 = vmul.f32 %v568_v1, %v566_v59 }
 0x7ab   :  { %530 = vmatmul.mubr.msk.f32.vlgmr.msra.gmra.mrb[2].mxu1 %vm71_vm1, %v359_v2 }
 0x87e   :  { %v435_v4 = vpop.f32.mrb[2].mxu1 }
 0x87f   :  { %v436_v5 = vadd.f32 %v490_v3, %v435_v4  ;;  %v531_v6 = vpop.f32.mrb[3].mxu1 }
 0x881   :  { %v439_v7 = vsel %vm71_vm1, %v436_v5, -inf }
 0x882   :  { %440 = vmax.xlane.f32.xlu0 %v439_v7 }
 0x90f   :  { %v441_v8 = vpop.xlane.xlu0 %440 }
 0x910   :  { %v442_v9 = vsub.f32 %v436_v5, %v441_v8 }
 0x912   :  { %v443_v10 = vmul.f32 1.442695, %v442_v9 }
 0x914   :  { %569 = vpow2.f32 %v443_v10 }
 0x91e   :  { %v570_v11 = vpop.eup %569 }
 0x91f   :  { %v445_v12 = vsel %vm71_vm1, %v570_v11, 0.0 }
 0x920   :  { %446 = vadd.xlane.f32.xlu1 %v445_v12 }
 0x9ad   :  { %v447_v13 = vpop.xlane.xlu1 %446 }
 0x9ae   :  { %571 = vrcp.f32 %v447_v13 }
 0x9b8   :  { %v572_v14 = vpop.eup %571 }
 0x9b9   :  { %v450_v15 = vmul.f32 16.0, %v572_v14  ;;  %v449_v16 = vmul.f32 %v572_v14, %v570_v11 }
 0x9bb   :  { %v451_v17 = vmul.f32 %v450_v15, %v757_v34 }
 0x9bd   :  { %v452_v18 = vadd.f32 %v451_v17, %v449_v16 }
 0x9bf   :  { %v453_v19 = vsel %vm71_vm1, %v452_v18, -inf }
 0x9c0   :  { %454 = vmax.xlane.f32.xlu0 %v453_v19 }
 0xa4d   :  { %v455_v20 = vpop.xlane.xlu0 %454 }
 0xa4e   :  { %v456_v21 = vsub.f32 %v452_v18, %v455_v20 }
 0xa50   :  { %v457_v22 = vmul.f32 1.442695, %v456_v21 }
 0xa52   :  { %573 = vpow2.f32 %v457_v22 }
 0xa5c   :  { %v574_v23 = vpop.eup %573 }
 0xa5d   :  { %v459_v24 = vsel %vm71_vm1, %v574_v23, 0.0 }
 0xa5e   :  { %460 = vadd.xlane.f32.xlu1 %v459_v24 }
 0xaeb   :  { %v461_v25 = vpop.xlane.xlu1 %460 }
 0xaec   :  { %575 = vrcp.f32 %v461_v25 }
 0xaf6   :  { %v576_v26 = vpop.eup %575 }
 0xaf7   :  { %v463_v27 = vmul.f32 %v576_v26, %v574_v23 }
 0xaf9   :  { %464 = vst.msk [vmem:[#allocation8] sm:$0xff] %vm71_vm1, %v463_v27 }
 0xafa   :  { %654 = shalt.err (!%p651_p0)
}
 0xafb   :  { %s655_s10 = scalar_lea.hbm %s794_s4, 128 }
 0xafc   :  { %p656_p1 = scmp.ne.s32.totalorder %s794_s4, %s655_s10  ;;  %p659_p2 = scmp.lt.u32.totalorder %s655_s10, %s794_s4 }
 0xafe   :  { %p661_p3 = pnand %p659_p2, %p656_p1 }
 0xb00   :  { %664 = shalt.err (!%p661_p3)
}
 0xb01   :  { %474 = dma.vmem_to_hbm [thread:$0]  %s472_s6, 128, %s794_s4, [#allocation4]  }
 0xb02   :  { %669 = dma.done.wait [#allocation4], 128  }
 0xb03   :  { %670 = vsyncadd [#allocation4], 4294967168 }
 0xb04   :  { %478 = vsyncpa [#allocation3], 1 }
 0xb05   :  { %479 = vsyncpa [#allocation6], 1 }
 0xb06   :  { %480 = vsyncpa [#allocation4], 1 }

</bundles_post_ra>
